<compile_context>
chip_gen: v6e
topology: v6e:2x2x1
jax: 0.10.0
libtpu: 0.0.40
codegen_flags: <defaults>
</compile_context>

<pallas_src>
import jax
import jax.numpy as jnp
from jax.experimental import pallas as pl
from jax.experimental.pallas import tpu as pltpu


def _round_up(x, m):
    return (x + m - 1) // m * m


def attention_pooling_kernel(x_ref, w_ref, b_ref, o_ref, m_sc, l_sc, acc_sc):
    """Grid = (batch_blocks [parallel], seq_blocks [arbitrary]).

    x_ref: (TB, TS, Hp) input tile (native dtype)
    w_ref: (1, 1, Hp)   attention weight vector
    b_ref: (1,)         attention bias (SMEM)
    o_ref: (TB, Hp)     pooled context (written on last seq step)
    m_sc/l_sc: (TB,1,1) online-softmax max / denominator (f32)
    acc_sc:  (TB,1,Hp)  unnormalized context accumulator (f32)
    """
    si = pl.program_id(1)

    @pl.when(si == 0)
    def _init():
        m_sc[...] = jnp.full_like(m_sc, -jnp.inf)
        l_sc[...] = jnp.zeros_like(l_sc)
        acc_sc[...] = jnp.zeros_like(acc_sc)

    x = x_ref[...]                      # (TB, TS, Hp), no full-slab upcast
    tb, _, hp = x.shape

    # Attention weight vector as a single "query": (TB, 1, Hp).
    q = jnp.broadcast_to(w_ref[...], (tb, 1, hp)).astype(x.dtype)

    # Scores on the MXU: (TB,1,Hp) x (TB,TS,Hp) -> (TB,1,TS), f32 accumulate.
    s = jnp.einsum("bqh,bkh->bqk", q, x,
                   preferred_element_type=jnp.float32)
    s = s + b_ref[0]                    # scalar bias from SMEM

    # Online softmax over the sequence (lane) axis.
    m_prev = m_sc[...]                                         # (TB,1,1)
    m_new = jnp.maximum(m_prev, jnp.max(s, axis=-1, keepdims=True))
    alpha = jnp.exp(m_prev - m_new)                            # (TB,1,1)
    p = jnp.exp(s - m_new)                                     # (TB,1,TS) f32
    l_sc[...] = alpha * l_sc[...] + jnp.sum(p, axis=-1, keepdims=True)

    # Unnormalized context on the MXU: (TB,1,TS) x (TB,TS,Hp) -> (TB,1,Hp).
    ctx = jnp.einsum("bqk,bkh->bqh", p.astype(x.dtype), x,
                     preferred_element_type=jnp.float32)
    acc_sc[...] = alpha * acc_sc[...] + ctx
    m_sc[...] = m_new

    @pl.when(si == pl.num_programs(1) - 1)
    def _finalize():
        inv = pl.reciprocal(l_sc[...], approx=False)           # (TB,1,1)
        o_ref[...] = (acc_sc[...] * inv)[:, 0, :].astype(o_ref.dtype)


def attention_pooling(outputs, w, b, *, batch_block=8,
                      seq_block_budget_bytes=16 * 1024 * 1024):
    """outputs: (B, S, H); w: (H,); b: () -> (B, H)."""
    B, S, H = outputs.shape
    out_dtype = outputs.dtype
    itemsize = jnp.dtype(out_dtype).itemsize

    TB = batch_block
    Hp = _round_up(H, 128)      # lane-dense, 128-aligned hidden dim
    Bp = _round_up(B, TB)       # full (8, 128)-aligned output tiles

    # Sequence tile: full S unless the double-buffered x block is too large.
    # Only tile when S is a multiple of 8 (block divisibility rule); a full-S
    # block is always legal regardless of S.
    def _x_block_bytes(ts):
        return 2 * TB * ts * Hp * itemsize      # double-buffered input block

    if S % 8 == 0 and _x_block_bytes(S) > seq_block_budget_bytes:
        TS = 8
        for cand in range(S, 7, -8):
            if S % cand == 0 and _x_block_bytes(cand) <= seq_block_budget_bytes:
                TS = cand
                break
    else:
        TS = S

    # Zero-pad batch and hidden; padding is sliced off below and is inert
    # (padded w / x columns are zero, padded batch rows are discarded).
    x = outputs
    if Bp != B or Hp != H:
        x = jnp.pad(x, ((0, Bp - B), (0, 0), (0, Hp - H)))
    w3 = jnp.pad(w.reshape(1, 1, H), ((0, 0), (0, 0), (0, Hp - H)))
    b_arr = jnp.asarray(b, dtype=jnp.float32).reshape(1)

    grid = (Bp // TB, S // TS)

    cost = pl.CostEstimate(
        flops=int(4 * Bp * S * Hp),                    # two matvec contractions
        transcendentals=int(Bp * S),                   # exp in the softmax
        bytes_accessed=int(Bp * S * Hp * itemsize
                           + Hp * jnp.dtype(w3.dtype).itemsize
                           + 4
                           + Bp * Hp * itemsize),
    )

    out = pl.pallas_call(
        attention_pooling_kernel,
        out_shape=jax.ShapeDtypeStruct((Bp, Hp), out_dtype),
        grid_spec=pltpu.PrefetchScalarGridSpec(
            num_scalar_prefetch=0,
            grid=grid,
            in_specs=[
                pl.BlockSpec((TB, TS, Hp), lambda bi, si: (bi, si, 0)),
                pl.BlockSpec((1, 1, Hp), lambda bi, si: (0, 0, 0)),
                pl.BlockSpec(memory_space=pltpu.MemorySpace.SMEM),
            ],
            out_specs=pl.BlockSpec((TB, Hp), lambda bi, si: (bi, 0)),
            scratch_shapes=[
                pltpu.VMEM((TB, 1, 1), jnp.float32),   # running max
                pltpu.VMEM((TB, 1, 1), jnp.float32),   # running denominator
                pltpu.VMEM((TB, 1, Hp), jnp.float32),  # unnormalized context
            ],
        ),
        compiler_params=pltpu.CompilerParams(
            dimension_semantics=("parallel", "arbitrary"),
            vmem_limit_bytes=32 * 1024 * 1024,
        ),
        cost_estimate=cost,
    )(x, w3, b_arr)

    return out[:B, :H]


if __name__ == "__main__":
    B, S, H = 2, 8, 32
    key = jax.random.PRNGKey(0)
    kx, kw, kb = jax.random.split(key, 3)

    outputs = jax.random.normal(kx, (B, S, H), dtype=jnp.float32)
    # Deterministic "Linear(hidden_size, 1)" parameters (synthetic init).
    bound = 1.0 / (H ** 0.5)
    w = jax.random.uniform(kw, (H,), minval=-bound, maxval=bound,
                           dtype=jnp.float32)
    b = jax.random.uniform(kb, (), minval=-bound, maxval=bound,
                           dtype=jnp.float32)

    out = attention_pooling(outputs, w, b)
    jax.block_until_ready(out)

    # Pure elementwise f32 reference (no MXU) for the correctness check.
    scores = jnp.sum(outputs * w[None, None, :], axis=-1) + b    # (B, S)
    weights = jax.nn.softmax(scores, axis=1)[..., None]          # (B, S, 1)
    ref = jnp.sum(weights * outputs, axis=1)                     # (B, H)

    assert out.shape == (B, H)
    max_err = jnp.max(jnp.abs(out - ref))
    assert jnp.allclose(out, ref, atol=5e-3, rtol=5e-3), max_err
    print("KERNEL_OK")
</pallas_src>

<mosaic_0001>
module attributes {stable_mosaic.version = 11 : i64} {
  func.func @attention_pooling_kernel(%arg0: i32, %arg1: i32, %arg2: memref<8x8x128xf32, #tpu.memory_space<vmem>>, %arg3: memref<1x1x128xf32, #tpu.memory_space<vmem>>, %arg4: memref<1xf32, #tpu.memory_space<smem>>, %arg5: memref<8x128xf32, #tpu.memory_space<vmem>>, %arg6: memref<8x1x1xf32, #tpu.memory_space<vmem>>, %arg7: memref<8x1x1xf32, #tpu.memory_space<vmem>>, %arg8: memref<8x1x128xf32, #tpu.memory_space<vmem>>) attributes {dimension_semantics = [#tpu.dimension_semantics<parallel>, #tpu.dimension_semantics<arbitrary>], iteration_bounds = array<i64: 1, 1>, scalar_prefetch = 0 : i64, scratch_operands = 3 : i64, tpu.core_type = #tpu.core_type<tc>, window_params = [{transform_indices = @transform_0, window_bounds = array<i64: 8, 8, 128>}, {pipeline_mode = #tpu.pipeline_mode<synchronous>, transform_indices = @transform_1, window_bounds = array<i64: 1, 1, 128>}, {transform_indices = @transform_2, window_bounds = array<i64: 1>}, {transform_indices = @transform_3, window_bounds = array<i64: 8, 128>}]} {
    %c0_i32 = arith.constant 0 : i32
    %0 = arith.cmpi eq, %arg1, %c0_i32 : i32
    %1 = arith.extui %0 : i1 to i32
    %c0_i32_0 = arith.constant 0 : i32
    %2 = arith.cmpi ne, %1, %c0_i32_0 : i32
    scf.if %2 {
      %cst_30 = arith.constant 0xFF800000 : f32
      %36 = vector.broadcast %cst_30 : f32 to vector<8x1x1xf32>
      %c0_31 = arith.constant 0 : index
      %c0_32 = arith.constant 0 : index
      %c0_33 = arith.constant 0 : index
      %37 = vector.load %arg6[%c0_31, %c0_32, %c0_33] : memref<8x1x1xf32, #tpu.memory_space<vmem>>, vector<8x1x1xf32>
      tpu.vector_store %arg6[%c0_31, %c0_32, %c0_33], %36 {strides = array<i32>} : memref<8x1x1xf32, #tpu.memory_space<vmem>>, vector<8x1x1xf32>,
      %cst_34 = arith.constant 0.000000e+00 : f32
      %38 = vector.broadcast %cst_34 : f32 to vector<8x1x1xf32>
      %c0_35 = arith.constant 0 : index
      %c0_36 = arith.constant 0 : index
      %c0_37 = arith.constant 0 : index
      %39 = vector.load %arg7[%c0_35, %c0_36, %c0_37] : memref<8x1x1xf32, #tpu.memory_space<vmem>>, vector<8x1x1xf32>
      tpu.vector_store %arg7[%c0_35, %c0_36, %c0_37], %38 {strides = array<i32>} : memref<8x1x1xf32, #tpu.memory_space<vmem>>, vector<8x1x1xf32>,
      %cst_38 = arith.constant 0.000000e+00 : f32
      %40 = vector.broadcast %cst_38 : f32 to vector<8x1x128xf32>
      %c0_39 = arith.constant 0 : index
      %c0_40 = arith.constant 0 : index
      %c0_41 = arith.constant 0 : index
      %41 = vector.load %arg8[%c0_39, %c0_40, %c0_41] : memref<8x1x128xf32, #tpu.memory_space<vmem>>, vector<8x1x128xf32>
      tpu.vector_store %arg8[%c0_39, %c0_40, %c0_41], %40 {strides = array<i32>} : memref<8x1x128xf32, #tpu.memory_space<vmem>>, vector<8x1x128xf32>,
    } else {
    }
    %c0 = arith.constant 0 : index
    %c0_1 = arith.constant 0 : index
    %c0_2 = arith.constant 0 : index
    %3 = vector.load %arg2[%c0, %c0_1, %c0_2] : memref<8x8x128xf32, #tpu.memory_space<vmem>>, vector<8x8x128xf32>
    %c0_3 = arith.constant 0 : index
    %c0_4 = arith.constant 0 : index
    %c0_5 = arith.constant 0 : index
    %4 = vector.load %arg3[%c0_3, %c0_4, %c0_5] : memref<1x1x128xf32, #tpu.memory_space<vmem>>, vector<1x1x128xf32>
    %5 = vector.shape_cast %4 : vector<1x1x128xf32> to vector<1x1x128xf32>
    %6 = vector.broadcast %5 : vector<1x1x128xf32> to vector<8x1x128xf32>
    "tpu.trace_start"() <{level = 10 : i32, message = "bqh,bkh->bqk"}> : () -> ()
    %cst = arith.constant dense<0.000000e+00> : vector<8x1x8xf32>
    %7 = tpu.matmul %6, %3, %cst {dimension_numbers = #tpu.dot_dimension_numbers<[2], [2], [1], [1], [0, 0, 0, 1, 1, 1], [0], [0]>} : vector<8x1x128xf32>, vector<8x8x128xf32>, vector<8x1x8xf32> -> vector<8x1x8xf32>
    "tpu.trace_stop"() : () -> ()
    %c0_6 = arith.constant 0 : index
    %8 = memref.load %arg4[%c0_6] : memref<1xf32, #tpu.memory_space<smem>>
    %9 = vector.broadcast %8 : f32 to vector<8x1x8xf32>
    %10 = arith.addf %7, %9 : vector<8x1x8xf32>
    %c0_7 = arith.constant 0 : index
    %c0_8 = arith.constant 0 : index
    %c0_9 = arith.constant 0 : index
    %11 = vector.load %arg6[%c0_7, %c0_8, %c0_9] : memref<8x1x1xf32, #tpu.memory_space<vmem>>, vector<8x1x1xf32>
    %cst_10 = arith.constant dense<0xFF800000> : vector<8x1xf32>
    %12 = vector.multi_reduction <maximumf>, %10, %cst_10 [2] : vector<8x1x8xf32> to vector<8x1xf32>
    %13 = vector.shape_cast %12 : vector<8x1xf32> to vector<8x1x1xf32>
    %14 = arith.maximumf %11, %13 : vector<8x1x1xf32>
    %15 = arith.subf %11, %14 : vector<8x1x1xf32>
    %16 = math.exp %15 : vector<8x1x1xf32>
    %17 = vector.broadcast %14 : vector<8x1x1xf32> to vector<8x1x8xf32>
    %18 = arith.subf %10, %17 : vector<8x1x8xf32>
    %19 = math.exp %18 : vector<8x1x8xf32>
    %c0_11 = arith.constant 0 : index
    %c0_12 = arith.constant 0 : index
    %c0_13 = arith.constant 0 : index
    %20 = vector.load %arg7[%c0_11, %c0_12, %c0_13] : memref<8x1x1xf32, #tpu.memory_space<vmem>>, vector<8x1x1xf32>
    %21 = arith.mulf %16, %20 : vector<8x1x1xf32>
    %cst_14 = arith.constant dense<0.000000e+00> : vector<8x1xf32>
    %22 = vector.multi_reduction <add>, %19, %cst_14 [2] : vector<8x1x8xf32> to vector<8x1xf32>
    %23 = vector.shape_cast %22 : vector<8x1xf32> to vector<8x1x1xf32>
    %24 = arith.addf %21, %23 : vector<8x1x1xf32>
    %c0_15 = arith.constant 0 : index
    %c0_16 = arith.constant 0 : index
    %c0_17 = arith.constant 0 : index
    %25 = vector.load %arg7[%c0_15, %c0_16, %c0_17] : memref<8x1x1xf32, #tpu.memory_space<vmem>>, vector<8x1x1xf32>
    tpu.vector_store %arg7[%c0_15, %c0_16, %c0_17], %24 {strides = array<i32>} : memref<8x1x1xf32, #tpu.memory_space<vmem>>, vector<8x1x1xf32>,
    "tpu.trace_start"() <{level = 10 : i32, message = "bqk,bkh->bqh"}> : () -> ()
    %cst_18 = arith.constant dense<0.000000e+00> : vector<8x1x128xf32>
    %26 = tpu.matmul %19, %3, %cst_18 {dimension_numbers = #tpu.dot_dimension_numbers<[2], [1], [1], [2], [0, 0, 0, 1, 1, 2], [0], [0]>} : vector<8x1x8xf32>, vector<8x8x128xf32>, vector<8x1x128xf32> -> vector<8x1x128xf32>
    "tpu.trace_stop"() : () -> ()
    %c0_19 = arith.constant 0 : index
    %c0_20 = arith.constant 0 : index
    %c0_21 = arith.constant 0 : index
    %27 = vector.load %arg8[%c0_19, %c0_20, %c0_21] : memref<8x1x128xf32, #tpu.memory_space<vmem>>, vector<8x1x128xf32>
    %28 = vector.broadcast %16 : vector<8x1x1xf32> to vector<8x1x128xf32>
    %29 = arith.mulf %28, %27 : vector<8x1x128xf32>
    %30 = arith.addf %29, %26 : vector<8x1x128xf32>
    %c0_22 = arith.constant 0 : index
    %c0_23 = arith.constant 0 : index
    %c0_24 = arith.constant 0 : index
    %31 = vector.load %arg8[%c0_22, %c0_23, %c0_24] : memref<8x1x128xf32, #tpu.memory_space<vmem>>, vector<8x1x128xf32>
    tpu.vector_store %arg8[%c0_22, %c0_23, %c0_24], %30 {strides = array<i32>} : memref<8x1x128xf32, #tpu.memory_space<vmem>>, vector<8x1x128xf32>,
    %c0_25 = arith.constant 0 : index
    %c0_26 = arith.constant 0 : index
    %c0_27 = arith.constant 0 : index
    %32 = vector.load %arg6[%c0_25, %c0_26, %c0_27] : memref<8x1x1xf32, #tpu.memory_space<vmem>>, vector<8x1x1xf32>
    tpu.vector_store %arg6[%c0_25, %c0_26, %c0_27], %14 {strides = array<i32>} : memref<8x1x1xf32, #tpu.memory_space<vmem>>, vector<8x1x1xf32>,
    %c0_i32_28 = arith.constant 0 : i32
    %33 = arith.cmpi eq, %arg1, %c0_i32_28 : i32
    %34 = arith.extui %33 : i1 to i32
    %c0_i32_29 = arith.constant 0 : i32
    %35 = arith.cmpi ne, %34, %c0_i32_29 : i32
    scf.if %35 {
      %c0_30 = arith.constant 0 : index
      %c0_31 = arith.constant 0 : index
      %c0_32 = arith.constant 0 : index
      %36 = vector.load %arg7[%c0_30, %c0_31, %c0_32] : memref<8x1x1xf32, #tpu.memory_space<vmem>>, vector<8x1x1xf32>
      %37 = tpu.reciprocal %36 : vector<8x1x1xf32> -> vector<8x1x1xf32>
      %c0_33 = arith.constant 0 : index
      %c0_34 = arith.constant 0 : index
      %c0_35 = arith.constant 0 : index
      %38 = vector.load %arg8[%c0_33, %c0_34, %c0_35] : memref<8x1x128xf32, #tpu.memory_space<vmem>>, vector<8x1x128xf32>
      %39 = vector.broadcast %37 : vector<8x1x1xf32> to vector<8x1x128xf32>
      %40 = arith.mulf %38, %39 : vector<8x1x128xf32>
      %41 = vector.shape_cast %40 : vector<8x1x128xf32> to vector<8x128xf32>
      %c0_36 = arith.constant 0 : index
      %c0_37 = arith.constant 0 : index
      %42 = vector.load %arg5[%c0_36, %c0_37] : memref<8x128xf32, #tpu.memory_space<vmem>>, vector<8x128xf32>
      tpu.vector_store %arg5[%c0_36, %c0_37], %41 {strides = array<i32>} : memref<8x128xf32, #tpu.memory_space<vmem>>, vector<8x128xf32>,
    } else {
    }
    return
  }
  func.func @transform_0(%arg0: i32, %arg1: i32) -> (i32, i32, i32) {
    %c0_i32 = arith.constant 0 : i32
    %c0_i32_0 = arith.constant 0 : i32
    return %arg0, %arg1, %c0_i32 : i32, i32, i32
  }
  func.func @transform_1(%arg0: i32, %arg1: i32) -> (i32, i32, i32) {
    %c0_i32 = arith.constant 0 : i32
    %c0_i32_0 = arith.constant 0 : i32
    %c0_i32_1 = arith.constant 0 : i32
    %c0_i32_2 = arith.constant 0 : i32
    return %c0_i32, %c0_i32_0, %c0_i32_1 : i32, i32, i32
  }
  func.func @transform_2(%arg0: i32, %arg1: i32) -> i32 {
    %c0_i32 = arith.constant 0 : i32
    %c0_i32_0 = arith.constant 0 : i32
    return %c0_i32 : i32
  }
  func.func @transform_3(%arg0: i32, %arg1: i32) -> (i32, i32) {
    %c0_i32 = arith.constant 0 : i32
    %c0_i32_0 = arith.constant 0 : i32
    return %arg0, %c0_i32 : i32, i32
  }
}

</mosaic_0001>

<bundles_post_ra>
// kernel: tpu_custom_call.1
= control target key start
LH: loop header
LB: loop body
LE: loop exit
PB: predicated region body
PF: predicated region fallthrough
CT: control target
= control target key end

     0   :  { %9 = vsyncpa [#allocation7], 0  ;;  %s2292_s0 = inlined_call_operand.hbm [shape: f32[8,8,128], index: 0, kind: input, shape index: {}]   ;;  %s2293_s1 = inlined_call_operand.vmem [shape: f32[1,1,128], index: 1, kind: input, shape index: {}]   ;;  %s2294_s2 = inlined_call_operand.<no memory space> [shape: f32[1], index: 2, kind: input, shape index: {}]   ;;  %s2295_s3 = inlined_call_operand.hbm [shape: f32[8,128], index: 3, kind: output, shape index: {}]  }
   0x1   :  { %10 = vsyncpa [#allocation8], 0  ;;  %s1949_s12 = smov [#allocation6]  }
   0x2   :  { %s16_s13 = sshll.u32 %s1949_s12, 4  ;;  %s17_s13 = int_to_ptr.vmem [resolvable:$true] %s16_s13 }
   0x3   :  { %s1913_s14 = scalar_lea.vmem %s17_s13, 1024  ;;  %p1918_p1 = scmp.lt.s32.totalorder %s17_s13, %s17_s13 }
   0x4   :  { %p1914_p0 = scmp.ne.s32.totalorder %s17_s13, %s1913_s14  ;;  %p1919_p2 = scmp.lt.s32.totalorder %s1913_s14, %s1913_s14 }
   0x6   :  { %p1920_p3 = por %p1919_p2, %p1918_p1 }
   0x8   :  { %p1921_p4 = pnand %p1920_p3, %p1914_p0 }
   0xa   :  { %1924 = shalt.err (!%p1921_p4)
}
   0xb   :  { %s1950_s15 = smov 128   ;;  %s1951_s16 = smov 8  }
   0xc   :  { %22 = dma.hbm_to_vmem [thread:$0]  %s2292_s0, 1024, %s17_s13, [#allocation7], %s1950_s15, %s1950_s15, %s1951_s16  }
   0xd   :  { %1945 = dma.done.wait [#allocation7], 1024  }
   0xe   :  { %1946 = vsyncadd [#allocation7], 4294966272  ;;  %v1952_v0 = vmov 0.0   ;;  %vm1953_vm0 = vmmov 0   ;;  %v59_v1 = vld [vmem:[#allocation6] sm:$0xff]  ;;  %v60_v2 = vld [vmem:[#allocation6 + $0x8] sm:$0xff]  ;;  %v69_v11 = vstv %s2294_s2 }
   0xf   :  { %1766 = vmatprep.subr.mxu0 %v1952_v0  ;;  %51 = vst [vmem:[#allocation4] sm:$0x1] %v1952_v0  ;;  %52 = vst [vmem:[#allocation4 + $0x1] sm:$0x1] %v1952_v0  ;;  %1771 = vmatprep.subr.mxu1 %v1952_v0  ;;  %v67_v3 = vld [vmem:[%s2293_s1] sm:$0x1] }
  0x10   :  { %53 = vst [vmem:[#allocation4 + $0x2] sm:$0x1] %v1952_v0  ;;  %54 = vst [vmem:[#allocation4 + $0x3] sm:$0x1] %v1952_v0  ;;  %1768 = vmatprep.mubr.msk.f32.mxu0 %vm1953_vm0, %v1952_v0  ;;  %1773 = vmatprep.mubr.msk.f32.mxu1 %vm1953_vm0, %v1952_v0  ;;  %v1999_v4 = vld [vmem:[#allocation6 + $0x10] sm:$0xff]  ;;  %v2002_v5 = vld [vmem:[#allocation6 + $0x18] sm:$0xff] }
  0x11   :  { %55 = vst [vmem:[#allocation4 + $0x4] sm:$0x1] %v1952_v0  ;;  %56 = vst [vmem:[#allocation4 + $0x5] sm:$0x1] %v1952_v0  ;;  %1767 = vmatpush3.xpose.msra.mxu0 %v59_v1  ;;  %1772 = vmatpush3.xpose.msra.mxu1 %v60_v2  ;;  %v2010_v6 = vld [vmem:[#allocation6 + $0x20] sm:$0xff]  ;;  %v2014_v7 = vld [vmem:[#allocation6 + $0x28] sm:$0xff] }
  0x12   :  { %57 = vst [vmem:[#allocation4 + $0x6] sm:$0x1] %v1952_v0  ;;  %58 = vst [vmem:[#allocation4 + $0x7] sm:$0x1] %v1952_v0  ;;  %1776 = vmatprep.subr.mxu0 %v1952_v0  ;;  %1781 = vmatprep.subr.mxu1 %v1952_v0  ;;  %v2020_v8 = vld [vmem:[#allocation6 + $0x30] sm:$0xff]  ;;  %v2025_v9 = vld [vmem:[#allocation6 + $0x38] sm:$0xff] }
  0x13   :  { %vm34_vm1 = vcmask 0   ;;  %v1954_v10 = vmov -inf   ;;  %vm638_vm2 = vcmask 57344   ;;  %v1955_v43 = vmov 0   ;;  %s1957_s2 = smov [#allocation9]  }
  0x14   :  { %1769 = vmatmul.mubr.f32.vlgmr.msra.gmra.mxu0 %v67_v3  ;;  %1774 = vmatmul.mubr.f32.vlgmr.msra.gmra.mxu1 %v67_v3  ;;  %35 = vst.msk [vmem:[#allocation2] sm:$0x1] %vm34_vm1, %v1954_v10  ;;  %36 = vst.msk [vmem:[#allocation2 + $0x1] sm:$0x1] %vm34_vm1, %v1954_v10  ;;  %vm848_vm3 = vcmask 64512   ;;  %s1717_s21 = sshll.u32 %s1957_s2, 4  ;;  %s1718_s21 = int_to_ptr.vmem [resolvable:$true] %s1717_s21 }
  0x15   :  { %1777 = vmatpush3.xpose.msra.mxu0 %v1999_v4  ;;  %1778 = vmatprep.mubr.msk.f32.mxu0 %vm1953_vm0, %v1952_v0  ;;  %37 = vst.msk [vmem:[#allocation2 + $0x2] sm:$0x1] %vm34_vm1, %v1954_v10  ;;  %38 = vst.msk [vmem:[#allocation2 + $0x3] sm:$0x1] %vm34_vm1, %v1954_v10  ;;  %s1925_s22 = scalar_lea.vmem %s1718_s21, 128  ;;  %p1930_p6 = scmp.lt.s32.totalorder %s1718_s21, %s1718_s21 }
  0x16   :  { %1782 = vmatpush3.xpose.msra.mxu1 %v2002_v5  ;;  %1783 = vmatprep.mubr.msk.f32.mxu1 %vm1953_vm0, %v1952_v0  ;;  %39 = vst.msk [vmem:[#allocation2 + $0x4] sm:$0x1] %vm34_vm1, %v1954_v10  ;;  %40 = vst.msk [vmem:[#allocation2 + $0x5] sm:$0x1] %vm34_vm1, %v1954_v10  ;;  %p1926_p5 = scmp.ne.s32.totalorder %s1718_s21, %s1925_s22  ;;  %p1931_p7 = scmp.lt.s32.totalorder %s1925_s22, %s1925_s22 }
  0x17   :  { %1786 = vmatprep.subr.mxu0 %v1952_v0  ;;  %1791 = vmatprep.subr.mxu1 %v1952_v0  ;;  %41 = vst.msk [vmem:[#allocation2 + $0x6] sm:$0x1] %vm34_vm1, %v1954_v10  ;;  %42 = vst.msk [vmem:[#allocation2 + $0x7] sm:$0x1] %vm34_vm1, %v1954_v10 }
  0x18   :  { %1779 = vmatmul.mubr.f32.vlgmr.msra.gmra.mxu0 %v67_v3  ;;  %43 = vst.msk [vmem:[#allocation3] sm:$0x1] %vm34_vm1, %v1952_v0  ;;  %44 = vst.msk [vmem:[#allocation3 + $0x1] sm:$0x1] %vm34_vm1, %v1952_v0  ;;  %1855 = vset.pattern.permute.xlu0 %v1955_v43  ;;  %p1932_p8 = por %p1931_p7, %p1930_p6 }
  0x19   :  { %1784 = vmatmul.mubr.f32.vlgmr.msra.gmra.mxu1 %v67_v3  ;;  %1787 = vmatpush3.xpose.msra.mxu0 %v2010_v6  ;;  %45 = vst.msk [vmem:[#allocation3 + $0x2] sm:$0x1] %vm34_vm1, %v1952_v0  ;;  %46 = vst.msk [vmem:[#allocation3 + $0x3] sm:$0x1] %vm34_vm1, %v1952_v0 }
  0x1a   :  { %1788 = vmatprep.mubr.msk.f32.mxu0 %vm1953_vm0, %v1952_v0  ;;  %1792 = vmatpush3.xpose.msra.mxu1 %v2014_v7  ;;  %47 = vst.msk [vmem:[#allocation3 + $0x4] sm:$0x1] %vm34_vm1, %v1952_v0  ;;  %48 = vst.msk [vmem:[#allocation3 + $0x5] sm:$0x1] %vm34_vm1, %v1952_v0  ;;  %p1933_p9 = pnand %p1932_p8, %p1926_p5 }
  0x1b   :  { %1793 = vmatprep.mubr.msk.f32.mxu1 %vm1953_vm0, %v1952_v0  ;;  %1796 = vmatprep.subr.mxu0 %v1952_v0  ;;  %49 = vst.msk [vmem:[#allocation3 + $0x6] sm:$0x1] %vm34_vm1, %v1952_v0  ;;  %50 = vst.msk [vmem:[#allocation3 + $0x7] sm:$0x1] %vm34_vm1, %v1952_v0  ;;  %v2101_v45 = vld [vmem:[#allocation2] sm:$0x1] }
  0x1c   :  { %1789 = vmatmul.mubr.f32.vlgmr.msra.gmra.mxu0 %v67_v3  ;;  %1801 = vmatprep.subr.mxu1 %v1952_v0  ;;  %v2106_v48 = vld [vmem:[#allocation2 + $0x1] sm:$0x1]  ;;  %v2108_v49 = vld [vmem:[#allocation2 + $0x2] sm:$0x1]  ;;  %v2121_v55 = vld [vmem:[#allocation2 + $0x3] sm:$0x1] }
  0x1d   :  { %1794 = vmatmul.mubr.f32.vlgmr.msra.gmra.mxu1 %v67_v3  ;;  %1797 = vmatpush3.xpose.msra.mxu0 %v2020_v8  ;;  %v2123_v56 = vld [vmem:[#allocation2 + $0x4] sm:$0x1]  ;;  %v2140_v63 = vld [vmem:[#allocation2 + $0x5] sm:$0x1] }
  0x1e   :  { %1798 = vmatprep.mubr.msk.f32.mxu0 %vm1953_vm0, %v1952_v0  ;;  %1802 = vmatpush3.xpose.msra.mxu1 %v2025_v9 }
  0x1f   :  { %1803 = vmatprep.mubr.msk.f32.mxu1 %vm1953_vm0, %v1952_v0  ;;  %1806 = vmatprep.subr.mxu0 %v1952_v0 }
  0x20   :  { %1799 = vmatmul.mubr.f32.vlgmr.msra.gmra.mxu0 %v67_v3  ;;  %1811 = vmatprep.subr.mxu1 %v1952_v0 }
  0x21   :  { %1804 = vmatmul.mubr.f32.vlgmr.msra.gmra.mxu1 %v67_v3  ;;  %1807 = vmatpush3.msra.mxu0 %v59_v1  ;;  %v2142_v1 = vld [vmem:[#allocation2 + $0x6] sm:$0x1] }
  0x22   :  { %1808 = vmatprep.mubr.msk.f32.mxu0 %vm1953_vm0, %v1952_v0  ;;  %1812 = vmatpush3.msra.mxu1 %v60_v2 }
  0x23   :  { %1813 = vmatprep.mubr.msk.f32.mxu1 %vm1953_vm0, %v1952_v0  ;;  %1816 = vmatprep.subr.mxu0 %v1952_v0 }
  0x24   :  { %1821 = vmatprep.subr.mxu1 %v1952_v0  ;;  %1856 = vset.pattern.permute.xlu1 %v1955_v43 }
  0xd4   :  { %v136_v12 = vpop.f32.mrf.mxu0  ;;  %v206_v13 = vpop.f32.mrf.mxu1 }
  0xd5   :  { %v2069_v14 = vadd.f32 %v136_v12, %v69_v11  ;;  %v2071_v15 = vadd.f32 %v206_v13, %v69_v11 }
  0xd6   :  { %v1770_v16 = vpop.f32.mrf.mxu0  ;;  %v1775_v17 = vpop.f32.mrf.mxu1 }
  0xd7   :  { %v639_v18 = vsel %vm638_vm2, %v2069_v14, -inf  ;;  %v642_v21 = vsel %vm638_vm2, %v2071_v15, -inf  ;;  %v2159_v16 = vld [vmem:[#allocation2 + $0x7] sm:$0x1] }
  0xd8   :  { %640 = vmax.xlane.f32.xlu0 %v639_v18  ;;  %v276_v19 = vpop.f32.mrf.mxu0 }
  0xd9   :  { %v2075_v20 = vadd.f32 %v276_v19, %v69_v11  ;;  %v346_v22 = vpop.f32.mrf.mxu1 }
  0xda   :  { %v1780_v23 = vpop.f32.mrf.mxu0  ;;  %v2079_v24 = vadd.f32 %v346_v22, %v69_v11 }
  0xdb   :  { %v1785_v25 = vpop.f32.mrf.mxu1  ;;  %v645_v26 = vsel %vm638_vm2, %v2075_v20, -inf  ;;  %v700_v23 = vlaneseq }
  0xdc   :  { %643 = vmax.xlane.f32.xlu0 %v642_v21  ;;  %646 = vmax.xlane.f32.xlu1 %v645_v26  ;;  %v416_v27 = vpop.f32.mrf.mxu0  ;;  %v648_v29 = vsel %vm638_vm2, %v2079_v24, -inf }
  0xdd   :  { %v2083_v28 = vadd.f32 %v416_v27, %v69_v11  ;;  %v486_v30 = vpop.f32.mrf.mxu1  ;;  %v2181_v25 = vshrl.u32 %v700_v23, 7 }
  0xde   :  { %v1790_v31 = vpop.f32.mrf.mxu0  ;;  %v2087_v32 = vadd.f32 %v486_v30, %v69_v11 }
  0xdf   :  { %v1795_v33 = vpop.f32.mrf.mxu1  ;;  %v651_v34 = vsel %vm638_vm2, %v2083_v28, -inf  ;;  %v2184_v26 = vsub.s32 0, %v2181_v25 }
  0xe0   :  { %649 = vmax.xlane.f32.xlu1 %v648_v29  ;;  %652 = vmax.xlane.f32.xlu0 %v651_v34  ;;  %v556_v35 = vpop.f32.mrf.mxu0  ;;  %v654_v37 = vsel %vm638_vm2, %v2087_v32, -inf }
  0xe1   :  { %v2091_v36 = vadd.f32 %v556_v35, %v69_v11  ;;  %v626_v38 = vpop.f32.mrf.mxu1 }
  0xe2   :  { %v1800_v39 = vpop.f32.mrf.mxu0  ;;  %v2095_v40 = vadd.f32 %v626_v38, %v69_v11 }
  0xe3   :  { %v1805_v41 = vpop.f32.mrf.mxu1  ;;  %v657_v42 = vsel %vm638_vm2, %v2091_v36, -inf }
  0xe4   :  { %655 = vmax.xlane.f32.xlu1 %v654_v37  ;;  %658 = vmax.xlane.f32.xlu0 %v657_v42  ;;  %v660_v44 = vsel %vm638_vm2, %v2095_v40, -inf }
  0xe8   :  { %661 = vmax.xlane.f32.xlu1 %v660_v44 }
 0x161   :  { %v641_v46 = vpop.xlane.xlu0 %640 }
 0x162   :  { %v2104_v47 = vmax.f32 %v2101_v45, %v641_v46 }
 0x164   :  { %v671_v50 = vsub.f32 %v2101_v45, %v2104_v47  ;;  %1537 = vst.msk [vmem:[#allocation2] sm:$0x1] %vm34_vm1, %v2104_v47  ;;  %697 = vperm.xlu0 %1855, %v2104_v47  }
 0x165   :  { %v644_v51 = vpop.xlane.xlu0 %643  ;;  %v647_v52 = vpop.xlane.xlu1 %646 }
 0x166   :  { %v2116_v53 = vmax.f32 %v2106_v48, %v644_v51  ;;  %v2119_v54 = vmax.f32 %v2108_v49, %v647_v52 }
 0x168   :  { %v672_v57 = vsub.f32 %v2106_v48, %v2116_v53  ;;  %1538 = vst.msk [vmem:[#allocation2 + $0x1] sm:$0x1] %vm34_vm1, %v2116_v53  ;;  %706 = vperm.xlu1 %1856, %v2116_v53   ;;  %v673_v58 = vsub.f32 %v2108_v49, %v2119_v54  ;;  %1539 = vst.msk [vmem:[#allocation2 + $0x2] sm:$0x1] %vm34_vm1, %v2119_v54 }
 0x169   :  { %v650_v59 = vpop.xlane.xlu1 %649  ;;  %v653_v60 = vpop.xlane.xlu0 %652 }
 0x16a   :  { %v2135_v61 = vmax.f32 %v2121_v55, %v650_v59  ;;  %v2138_v62 = vmax.f32 %v2123_v56, %v653_v60 }
 0x16c   :  { %715 = vperm.xlu1 %1856, %v2119_v54   ;;  %v674_v2 = vsub.f32 %v2121_v55, %v2135_v61  ;;  %1540 = vst.msk [vmem:[#allocation2 + $0x3] sm:$0x1] %vm34_vm1, %v2135_v61  ;;  %v675_v3 = vsub.f32 %v2123_v56, %v2138_v62  ;;  %1541 = vst.msk [vmem:[#allocation2 + $0x4] sm:$0x1] %vm34_vm1, %v2138_v62 }
 0x16d   :  { %v656_v10 = vpop.xlane.xlu1 %655  ;;  %v659_v11 = vpop.xlane.xlu0 %658 }
 0x16e   :  { %v2154_v12 = vmax.f32 %v2140_v63, %v656_v10  ;;  %v2157_v13 = vmax.f32 %v2142_v1, %v659_v11  ;;  %v685_v48 = vmul.f32 1.442695, %v674_v2  ;;  %v687_v53 = vmul.f32 1.442695, %v675_v3  ;;  %v792_v3 = vld [vmem:[#allocation3 + $0x1] sm:$0x1] }
 0x170   :  { %724 = vperm.xlu1 %1856, %v2135_v61   ;;  %v676_v17 = vsub.f32 %v2140_v63, %v2154_v12  ;;  %1542 = vst.msk [vmem:[#allocation2 + $0x5] sm:$0x1] %vm34_vm1, %v2154_v12  ;;  %v677_v18 = vsub.f32 %v2142_v1, %v2157_v13  ;;  %1543 = vst.msk [vmem:[#allocation2 + $0x6] sm:$0x1] %vm34_vm1, %v2157_v13  ;;  %v791_v63 = vld [vmem:[#allocation3] sm:$0x1] }
 0x171   :  { %v662_v19 = vpop.xlane.xlu1 %661 }
 0x172   :  { %v2171_v21 = vmax.f32 %v2159_v16, %v662_v19  ;;  %v689_v45 = vmul.f32 1.442695, %v676_v17  ;;  %v691_v47 = vmul.f32 1.442695, %v677_v18  ;;  %v793_v17 = vld [vmem:[#allocation3 + $0x2] sm:$0x1] }
 0x174   :  { %733 = vperm.xlu1 %1856, %v2138_v62   ;;  %v678_v22 = vsub.f32 %v2159_v16, %v2171_v21  ;;  %1544 = vst.msk [vmem:[#allocation2 + $0x7] sm:$0x1] %vm34_vm1, %v2171_v21 }
 0x176   :  { %v693_v49 = vmul.f32 1.442695, %v678_v22 }
 0x178   :  { %742 = vperm.xlu1 %1856, %v2154_v12  }
 0x17c   :  { %751 = vperm.xlu1 %1856, %v2157_v13  }
 0x180   :  { %760 = vperm.xlu1 %1856, %v2171_v21  }
 0x1df   :  { %v698_v27 = vpop.permute.xlu0 %697 }
 0x1e0   :  { %v703_v29 = vrot.slane %v698_v27, %v2184_v26 }
 0x1e2   :  { %v767_v30 = vsub.f32 %v2069_v14, %v703_v29 }
 0x1e3   :  { %v707_v31 = vpop.permute.xlu1 %706 }
 0x1e4   :  { %v775_v33 = vmul.f32 1.442695, %v767_v30  ;;  %v712_v34 = vrot.slane %v707_v31, %v2184_v26 }
 0x1e6   :  { %1857 = vpow2.f32 %v775_v33  ;;  %v768_v35 = vsub.f32 %v2071_v15, %v712_v34 }
 0x1e7   :  { %v716_v37 = vpop.permute.xlu1 %715 }
 0x1e8   :  { %v777_v38 = vmul.f32 1.442695, %v768_v35  ;;  %v721_v39 = vrot.slane %v716_v37, %v2184_v26 }
 0x1ea   :  { %1859 = vpow2.f32 %v777_v38  ;;  %v769_v41 = vsub.f32 %v2075_v20, %v721_v39 }
 0x1eb   :  { %v725_v42 = vpop.permute.xlu1 %724 }
 0x1ec   :  { %v779_v43 = vmul.f32 1.442695, %v769_v41  ;;  %v730_v44 = vrot.slane %v725_v42, %v2184_v26  ;;  %v681_v42 = vmul.f32 1.442695, %v672_v57 }
 0x1ee   :  { %1861 = vpow2.f32 %v779_v43  ;;  %v770_v14 = vsub.f32 %v2079_v24, %v730_v44  ;;  %v794_v44 = vld [vmem:[#allocation3 + $0x3] sm:$0x1] }
 0x1ef   :  { %v734_v46 = vpop.permute.xlu1 %733 }
 0x1f0   :  { %v781_v51 = vmul.f32 1.442695, %v770_v14  ;;  %v739_v52 = vrot.slane %v734_v46, %v2184_v26 }
 0x1f2   :  { %1863 = vpow2.f32 %v781_v51  ;;  %v771_v15 = vsub.f32 %v2083_v28, %v739_v52 }
 0x1f3   :  { %v1858_v59 = vpop.eup %1857  ;;  %v743_v60 = vpop.permute.xlu1 %742 }
 0x1f4   :  { %v783_v10 = vmul.f32 1.442695, %v771_v15  ;;  %v748_v20 = vrot.slane %v743_v60, %v2184_v26  ;;  %1809 = vmatmul.mubr.msk.f32.vlgmr.msra.gmra.mxu0 %vm848_vm3, %v1858_v59  ;;  %v807_v11 = vsel %vm638_vm2, %v1858_v59, 0.0  ;;  %v795_v15 = vld [vmem:[#allocation3 + $0x4] sm:$0x1] }
 0x1f5   :  { %808 = vadd.xlane.f32.xlu1 %v807_v11  ;;  %1817 = vmatpush3.msra.mxu0 %v1999_v4  ;;  %v796_v11 = vld [vmem:[#allocation3 + $0x5] sm:$0x1] }
 0x1f6   :  { %1865 = vpow2.f32 %v783_v10  ;;  %v772_v24 = vsub.f32 %v2087_v32, %v748_v20  ;;  %1818 = vmatprep.mubr.msk.f32.mxu0 %vm1953_vm0, %v1952_v0  ;;  %1826 = vmatprep.subr.mxu0 %v1952_v0 }
 0x1f7   :  { %v1860_v28 = vpop.eup %1859  ;;  %v752_v19 = vpop.permute.xlu1 %751 }
 0x1f8   :  { %v785_v23 = vmul.f32 1.442695, %v772_v24  ;;  %v757_v27 = vrot.slane %v752_v19, %v2184_v26  ;;  %1814 = vmatmul.mubr.msk.f32.vlgmr.msra.gmra.mxu1 %vm848_vm3, %v1860_v28  ;;  %v810_v29 = vsel %vm638_vm2, %v1860_v28, 0.0 }
 0x1f9   :  { %811 = vadd.xlane.f32.xlu0 %v810_v29  ;;  %1822 = vmatpush3.msra.mxu1 %v2002_v5 }
 0x1fa   :  { %1867 = vpow2.f32 %v785_v23  ;;  %v773_v4 = vsub.f32 %v2091_v36, %v757_v27  ;;  %1823 = vmatprep.mubr.msk.f32.mxu1 %vm1953_vm0, %v1952_v0  ;;  %1831 = vmatprep.subr.mxu1 %v1952_v0  ;;  %v797_v27 = vld [vmem:[#allocation3 + $0x6] sm:$0x1] }
 0x1fb   :  { %v1862_v32 = vpop.eup %1861  ;;  %v761_v30 = vpop.permute.xlu1 %760 }
 0x1fc   :  { %v787_v31 = vmul.f32 1.442695, %v773_v4  ;;  %v766_v33 = vrot.slane %v761_v30, %v2184_v26  ;;  %1819 = vmatmul.mubr.msk.f32.vlgmr.msra.gmra.mxu0 %vm848_vm3, %v1862_v32  ;;  %v813_v34 = vsel %vm638_vm2, %v1862_v32, 0.0 }
 0x1fd   :  { %814 = vadd.xlane.f32.xlu0 %v813_v34  ;;  %1827 = vmatpush3.msra.mxu0 %v2010_v6 }
 0x1fe   :  { %1869 = vpow2.f32 %v787_v31  ;;  %v774_v5 = vsub.f32 %v2095_v40, %v766_v33  ;;  %1828 = vmatprep.mubr.msk.f32.mxu0 %vm1953_vm0, %v1952_v0  ;;  %1836 = vmatprep.subr.mxu0 %v1952_v0  ;;  %v798_v33 = vld [vmem:[#allocation3 + $0x7] sm:$0x1] }
 0x1ff   :  { %v1864_v36 = vpop.eup %1863 }
 0x200   :  { %v789_v35 = vmul.f32 1.442695, %v774_v5  ;;  %1824 = vmatmul.mubr.msk.f32.vlgmr.msra.gmra.mxu1 %vm848_vm3, %v1864_v36  ;;  %v816_v37 = vsel %vm638_vm2, %v1864_v36, 0.0 }
 0x201   :  { %817 = vadd.xlane.f32.xlu1 %v816_v37  ;;  %1832 = vmatpush3.msra.mxu1 %v2014_v7 }
 0x202   :  { %1871 = vpow2.f32 %v789_v35  ;;  %1833 = vmatprep.mubr.msk.f32.mxu1 %vm1953_vm0, %v1952_v0  ;;  %1841 = vmatprep.subr.mxu1 %v1952_v0 }
 0x203   :  { %v1866_v6 = vpop.eup %1865  ;;  %1873 = vpow2.f32 %v681_v42 }
 0x204   :  { %1829 = vmatmul.mubr.msk.f32.vlgmr.msra.gmra.mxu0 %vm848_vm3, %v1866_v6  ;;  %v819_v40 = vsel %vm638_vm2, %v1866_v6, 0.0 }
 0x205   :  { %820 = vadd.xlane.f32.xlu0 %v819_v40  ;;  %1837 = vmatpush3.msra.mxu0 %v2020_v8 }
 0x206   :  { %1838 = vmatprep.mubr.msk.f32.mxu0 %vm1953_vm0, %v1952_v0 }
 0x207   :  { %v1868_v38 = vpop.eup %1867 }
 0x208   :  { %1834 = vmatmul.mubr.msk.f32.vlgmr.msra.gmra.mxu1 %vm848_vm3, %v1868_v38  ;;  %v822_v7 = vsel %vm638_vm2, %v1868_v38, 0.0 }
 0x209   :  { %823 = vadd.xlane.f32.xlu1 %v822_v7  ;;  %1842 = vmatpush3.msra.mxu1 %v2025_v9  ;;  %v679_v9 = vmul.f32 1.442695, %v671_v50 }
 0x20a   :  { %1843 = vmatprep.mubr.msk.f32.mxu1 %vm1953_vm0, %v1952_v0  ;;  %v683_v0 = vmul.f32 1.442695, %v673_v58 }
 0x20b   :  { %v1870_v39 = vpop.eup %1869  ;;  %1875 = vpow2.f32 %v679_v9 }
 0x20c   :  { %1839 = vmatmul.mubr.msk.f32.vlgmr.msra.gmra.mxu0 %vm848_vm3, %v1870_v39  ;;  %v825_v41 = vsel %vm638_vm2, %v1870_v39, 0.0  ;;  %1877 = vpow2.f32 %v683_v0 }
 0x20d   :  { %826 = vadd.xlane.f32.xlu0 %v825_v41  ;;  %1879 = vpow2.f32 %v685_v48 }
 0x20e   :  { %1881 = vpow2.f32 %v687_v53  ;;  %v1433_v53 = vld [vmem:[#allocation4] sm:$0x1] }
 0x20f   :  { %v1872_v8 = vpop.eup %1871  ;;  %1883 = vpow2.f32 %v689_v45 }
 0x210   :  { %1844 = vmatmul.mubr.msk.f32.vlgmr.msra.gmra.mxu1 %vm848_vm3, %v1872_v8  ;;  %v828_v43 = vsel %vm638_vm2, %v1872_v8, 0.0  ;;  %1885 = vpow2.f32 %v691_v47  ;;  %v1874_v50 = vpop.eup %1873 }
 0x211   :  { %829 = vadd.xlane.f32.xlu1 %v828_v43  ;;  %1887 = vpow2.f32 %v693_v49  ;;  %v800_v13 = vmul.f32 %v1874_v50, %v792_v3 }
 0x218   :  { %v1876_v54 = vpop.eup %1875 }
 0x219   :  { %v1878_v55 = vpop.eup %1877  ;;  %v799_v1 = vmul.f32 %v1876_v54, %v791_v63 }
 0x21a   :  { %v1880_v56 = vpop.eup %1879  ;;  %v801_v21 = vmul.f32 %v1878_v55, %v793_v17 }
 0x21b   :  { %v1882_v57 = vpop.eup %1881  ;;  %v802_v51 = vmul.f32 %v1880_v56, %v794_v44 }
 0x21c   :  { %v1884_v58 = vpop.eup %1883  ;;  %v803_v10 = vmul.f32 %v1882_v57, %v795_v15 }
 0x21d   :  { %v1886_v61 = vpop.eup %1885  ;;  %v804_v19 = vmul.f32 %v1884_v58, %v796_v11 }
 0x21e   :  { %v1888_v62 = vpop.eup %1887  ;;  %v805_v32 = vmul.f32 %v1886_v61, %v797_v27 }
 0x21f   :  { %v806_v36 = vmul.f32 %v1888_v62, %v798_v33 }
 0x222   :  { %1452 = vperm.xlu1 %1856, %v1874_v50  }
 0x223   :  { %1443 = vperm.xlu0 %1855, %v1876_v54  }
 0x226   :  { %1461 = vperm.xlu1 %1856, %v1878_v55   ;;  %v1434_v55 = vld [vmem:[#allocation4 + $0x1] sm:$0x1] }
 0x227   :  { %1470 = vperm.xlu0 %1855, %v1880_v56  }
 0x22a   :  { %1479 = vperm.xlu1 %1856, %v1882_v57  }
 0x22b   :  { %1488 = vperm.xlu0 %1855, %v1884_v58  }
 0x22e   :  { %1497 = vperm.xlu1 %1856, %v1886_v61  }
 0x22f   :  { %1506 = vperm.xlu0 %1855, %v1888_v62  }
 0x27e   :  { %v809_v2 = vpop.xlane.xlu1 %808 }
 0x27f   :  { %v831_v12 = vadd.f32 %v809_v2, %v799_v1  ;;  %v1435_v1 = vld [vmem:[#allocation4 + $0x2] sm:$0x1] }
 0x281   :  { %840 = vst.msk [vmem:[#allocation3] sm:$0x1] %vm34_vm1, %v831_v12 }
 0x282   :  { %v812_v16 = vpop.xlane.xlu0 %811 }
 0x283   :  { %v832_v18 = vadd.f32 %v812_v16, %v800_v13 }
 0x285   :  { %841 = vst.msk [vmem:[#allocation3 + $0x1] sm:$0x1] %vm34_vm1, %v832_v18  ;;  %v1436_v18 = vld [vmem:[#allocation4 + $0x3] sm:$0x1] }
 0x286   :  { %v815_v22 = vpop.xlane.xlu0 %814 }
 0x287   :  { %v833_v14 = vadd.f32 %v815_v22, %v801_v21 }
 0x288   :  { %v1548_v46 = vld [vmem:[#allocation3] sm:$0x1] }
 0x289   :  { %842 = vst.msk [vmem:[#allocation3 + $0x2] sm:$0x1] %vm34_vm1, %v833_v14  ;;  %1889 = vrcp.f32 %v1548_v46 }
 0x28a   :  { %v818_v52 = vpop.xlane.xlu1 %817 }
 0x28b   :  { %v834_v59 = vadd.f32 %v818_v52, %v802_v51  ;;  %v1437_v52 = vld [vmem:[#allocation4 + $0x4] sm:$0x1] }
 0x28c   :  { %v1549_v60 = vld [vmem:[#allocation3 + $0x1] sm:$0x1] }
 0x28d   :  { %843 = vst.msk [vmem:[#allocation3 + $0x3] sm:$0x1] %vm34_vm1, %v834_v59  ;;  %1891 = vrcp.f32 %v1549_v60 }
 0x28e   :  { %v821_v20 = vpop.xlane.xlu0 %820 }
 0x28f   :  { %v835_v24 = vadd.f32 %v821_v20, %v803_v10 }
 0x290   :  { %v1550_v28 = vld [vmem:[#allocation3 + $0x2] sm:$0x1] }
 0x291   :  { %844 = vst.msk [vmem:[#allocation3 + $0x4] sm:$0x1] %vm34_vm1, %v835_v24  ;;  %1893 = vrcp.f32 %v1550_v28  ;;  %v1438_v24 = vld [vmem:[#allocation4 + $0x5] sm:$0x1] }
 0x292   :  { %v824_v23 = vpop.xlane.xlu1 %823 }
 0x293   :  { %v836_v29 = vadd.f32 %v824_v23, %v804_v19 }
 0x294   :  { %v1551_v4 = vld [vmem:[#allocation3 + $0x3] sm:$0x1] }
 0x295   :  { %845 = vst.msk [vmem:[#allocation3 + $0x5] sm:$0x1] %vm34_vm1, %v836_v29  ;;  %1895 = vrcp.f32 %v1551_v4 }
 0x296   :  { %v1890_v30 = vpop.eup %1889  ;;  %v827_v31 = vpop.xlane.xlu0 %826 }
 0x297   :  { %v837_v34 = vadd.f32 %v827_v31, %v805_v32  ;;  %1574 = vperm.xlu1 %1856, %v1890_v30   ;;  %v1439_v32 = vld [vmem:[#allocation4 + $0x6] sm:$0x1] }
 0x298   :  { %v1552_v5 = vld [vmem:[#allocation3 + $0x4] sm:$0x1] }
 0x299   :  { %846 = vst.msk [vmem:[#allocation3 + $0x6] sm:$0x1] %vm34_vm1, %v837_v34  ;;  %1897 = vrcp.f32 %v1552_v5 }
 0x29a   :  { %v1892_v35 = vpop.eup %1891  ;;  %v830_v37 = vpop.xlane.xlu1 %829 }
 0x29b   :  { %v838_v6 = vadd.f32 %v830_v37, %v806_v36  ;;  %1583 = vperm.xlu0 %1855, %v1892_v35   ;;  %v1440_v36 = vld [vmem:[#allocation4 + $0x7] sm:$0x1] }
 0x29c   :  { %v1553_v40 = vld [vmem:[#allocation3 + $0x5] sm:$0x1] }
 0x29d   :  { %847 = vst.msk [vmem:[#allocation3 + $0x7] sm:$0x1] %vm34_vm1, %v838_v6  ;;  %1899 = vrcp.f32 %v1553_v40 }
 0x29e   :  { %v1894_v38 = vpop.eup %1893  ;;  %v1444_v43 = vpop.permute.xlu0 %1443 }
 0x29f   :  { %1592 = vperm.xlu1 %1856, %v1894_v38   ;;  %v1453_v0 = vpop.permute.xlu1 %1452  ;;  %v1449_v48 = vrot.slane %v1444_v43, %v2184_v26 }
 0x2a0   :  { %v1554_v7 = vld [vmem:[#allocation3 + $0x6] sm:$0x1]  ;;  %v1458_v47 = vrot.slane %v1453_v0, %v2184_v26 }
 0x2a1   :  { %1901 = vrcp.f32 %v1554_v7  ;;  %v1513_v49 = vmul.f32 %v1449_v48, %v1433_v53  ;;  %v1956_v48 = vmov 1966171168  }
 0x2a2   :  { %v1896_v39 = vpop.eup %1895  ;;  %v1514_v61 = vmul.f32 %v1458_v47, %v1434_v55  ;;  %v1471_v62 = vpop.permute.xlu0 %1470  ;;  %v1665_v53 = vunpack.c.l.s4 %v1956_v48 }
 0x2a3   :  { %1601 = vperm.xlu0 %1855, %v1896_v39   ;;  %v1462_v50 = vpop.permute.xlu1 %1461  ;;  %v1476_v12 = vrot.slane %v1471_v62, %v2184_v26 }
 0x2a4   :  { %v1555_v41 = vld [vmem:[#allocation3 + $0x7] sm:$0x1]  ;;  %v1467_v58 = vrot.slane %v1462_v50, %v2184_v26 }
 0x2a5   :  { %1903 = vrcp.f32 %v1555_v41  ;;  %v1516_v14 = vmul.f32 %v1476_v12, %v1436_v18 }
 0x2a6   :  { %v1898_v8 = vpop.eup %1897  ;;  %v1515_v13 = vmul.f32 %v1467_v58, %v1435_v1  ;;  %v1489_v46 = vpop.permute.xlu0 %1488 }
 0x2a7   :  { %1610 = vperm.xlu1 %1856, %v1898_v8   ;;  %v1480_v16 = vpop.permute.xlu1 %1479  ;;  %v1494_v60 = vrot.slane %v1489_v46, %v2184_v26 }
 0x2a8   :  { %v1485_v44 = vrot.slane %v1480_v16, %v2184_v26 }
 0x2a9   :  { %v1518_v27 = vmul.f32 %v1494_v60, %v1438_v24 }
 0x2aa   :  { %v1900_v42 = vpop.eup %1899  ;;  %v1517_v10 = vmul.f32 %v1485_v44, %v1437_v52  ;;  %v1507_v29 = vpop.permute.xlu0 %1506 }
 0x2ab   :  { %1619 = vperm.xlu0 %1855, %v1900_v42   ;;  %v1498_v20 = vpop.permute.xlu1 %1497  ;;  %v1512_v33 = vrot.slane %v1507_v29, %v2184_v26 }
 0x2ac   :  { %v1503_v23 = vrot.slane %v1498_v20, %v2184_v26 }
 0x2ad   :  { %v1520_v6 = vmul.f32 %v1512_v33, %v1440_v36 }
 0x2ae   :  { %v1902_v9 = vpop.eup %1901  ;;  %v1519_v34 = vmul.f32 %v1503_v23, %v1439_v32 }
 0x2af   :  { %1628 = vperm.xlu1 %1856, %v1902_v9  }
 0x2b2   :  { %v1904_v45 = vpop.eup %1903 }
 0x2b3   :  { %1637 = vperm.xlu0 %1855, %v1904_v45  }
 0x2b4   :  { %v918_v54 = vpop.f32.mrf.mxu0 }
 0x2b5   :  { %v1521_v56 = vadd.f32 %v1513_v49, %v918_v54 }
 0x2b6   :  { %v1810_v57 = vpop.f32.mrf.mxu0 }
 0x2b7   :  { %1529 = vst [vmem:[#allocation4] sm:$0x1] %v1521_v56 }
 0x2b8   :  { %v991_v63 = vpop.f32.mrf.mxu1 }
 0x2b9   :  { %v1522_v2 = vadd.f32 %v1514_v61, %v991_v63  ;;  %v1666_v61 = vunpack.c.0.s8 %v1665_v53 }
 0x2ba   :  { %v1815_v3 = vpop.f32.mrf.mxu1 }
 0x2bb   :  { %1530 = vst [vmem:[#allocation4 + $0x1] sm:$0x1] %v1522_v2 }
 0x2bc   :  { %v1064_v17 = vpop.f32.mrf.mxu0 }
 0x2bd   :  { %v1523_v21 = vadd.f32 %v1515_v13, %v1064_v17 }
 0x2be   :  { %v1820_v22 = vpop.f32.mrf.mxu0  ;;  %v1564_v2 = vld [vmem:[#allocation4] sm:$0x1] }
 0x2bf   :  { %1531 = vst [vmem:[#allocation4 + $0x2] sm:$0x1] %v1523_v21  ;;  %v1669_v22 = vsub.s32 %v1666_v61, %v2181_v25 }
 0x2c0   :  { %v1137_v51 = vpop.f32.mrf.mxu1 }
 0x2c1   :  { %v1524_v15 = vadd.f32 %v1516_v14, %v1137_v51 }
 0x2c2   :  { %v1825_v59 = vpop.f32.mrf.mxu1  ;;  %v1565_v56 = vld [vmem:[#allocation4 + $0x1] sm:$0x1] }
 0x2c3   :  { %1532 = vst [vmem:[#allocation4 + $0x3] sm:$0x1] %v1524_v15 }
 0x2c4   :  { %v1210_v11 = vpop.f32.mrf.mxu0 }
 0x2c5   :  { %v1525_v28 = vadd.f32 %v1517_v10, %v1210_v11 }
 0x2c6   :  { %v1830_v19 = vpop.f32.mrf.mxu0  ;;  %v1566_v57 = vld [vmem:[#allocation4 + $0x2] sm:$0x1] }
 0x2c7   :  { %1533 = vst [vmem:[#allocation4 + $0x4] sm:$0x1] %v1525_v28 }
 0x2c8   :  { %v1283_v4 = vpop.f32.mrf.mxu1 }
 0x2c9   :  { %v1526_v30 = vadd.f32 %v1518_v27, %v1283_v4 }
 0x2ca   :  { %v1835_v31 = vpop.f32.mrf.mxu1  ;;  %v1567_v49 = vld [vmem:[#allocation4 + $0x3] sm:$0x1] }
 0x2cb   :  { %1534 = vst [vmem:[#allocation4 + $0x5] sm:$0x1] %v1526_v30 }
 0x2cc   :  { %v1356_v5 = vpop.f32.mrf.mxu0 }
 0x2cd   :  { %v1527_v35 = vadd.f32 %v1519_v34, %v1356_v5 }
 0x2ce   :  { %v1840_v37 = vpop.f32.mrf.mxu0  ;;  %v1568_v18 = vld [vmem:[#allocation4 + $0x4] sm:$0x1] }
 0x2cf   :  { %1535 = vst [vmem:[#allocation4 + $0x6] sm:$0x1] %v1527_v35 }
 0x2d0   :  { %v1429_v40 = vpop.f32.mrf.mxu1 }
 0x2d1   :  { %v1528_v38 = vadd.f32 %v1520_v6, %v1429_v40 }
 0x2d2   :  { %v1845_v7 = vpop.f32.mrf.mxu1  ;;  %v1569_v3 = vld [vmem:[#allocation4 + $0x5] sm:$0x1] }
 0x2d3   :  { %1536 = vst [vmem:[#allocation4 + $0x7] sm:$0x1] %v1528_v38 }
 0x2d6   :  { %v1570_v51 = vld [vmem:[#allocation4 + $0x6] sm:$0x1] }
 0x2da   :  { %v1571_v52 = vld [vmem:[#allocation4 + $0x7] sm:$0x1] }
 0x312   :  { %v1575_v39 = vpop.permute.xlu1 %1574 }
 0x313   :  { %v1580_v50 = vrot.slane %v1575_v39, %v2184_v26 }
 0x315   :  { %v1644_v12 = vmul.f32 %v1580_v50, %v1564_v2 }
 0x316   :  { %v1584_v41 = vpop.permute.xlu0 %1583 }
 0x317   :  { %v1589_v45 = vrot.slane %v1584_v41, %v2184_v26 }
 0x319   :  { %v1645_v62 = vmul.f32 %v1589_v45, %v1565_v56 }
 0x31a   :  { %v1593_v8 = vpop.permute.xlu1 %1592 }
 0x31b   :  { %v1598_v47 = vrot.slane %v1593_v8, %v2184_v26  ;;  %v1660_v44 = vcombine.low %v1644_v12, %v1645_v62 }
 0x31d   :  { %v1646_v63 = vmul.f32 %v1598_v47, %v1566_v57  ;;  %v1670_v20 = vrot.slane %v1660_v44, %v1669_v22 }
 0x31e   :  { %v1602_v42 = vpop.permute.xlu0 %1601 }
 0x31f   :  { %v1607_v43 = vrot.slane %v1602_v42, %v2184_v26 }
 0x321   :  { %v1647_v54 = vmul.f32 %v1607_v43, %v1567_v49 }
 0x322   :  { %v1611_v9 = vpop.permute.xlu1 %1610 }
 0x323   :  { %v1616_v1 = vrot.slane %v1611_v9, %v2184_v26  ;;  %v1661_v13 = vcombine.low %v1646_v63, %v1647_v54 }
 0x325   :  { %v1648_v14 = vmul.f32 %v1616_v1, %v1568_v18  ;;  %v1677_v15 = vrot.slane %v1661_v13, %v1669_v22 }
 0x326   :  { %v1620_v0 = vpop.permute.xlu0 %1619 }
 0x327   :  { %v1625_v55 = vrot.slane %v1620_v0, %v2184_v26  ;;  %v1692_v19 = vcombine.low %v1670_v20, %v1677_v15 }
 0x329   :  { %v1649_v16 = vmul.f32 %v1625_v55, %v1569_v3  ;;  %v1700_v27 = vrot.slane %v1692_v19, %v1669_v22 }
 0x32a   :  { %v1629_v58 = vpop.permute.xlu1 %1628 }
 0x32b   :  { %v1634_v17 = vrot.slane %v1629_v58, %v2184_v26  ;;  %v1662_v59 = vcombine.low %v1648_v14, %v1649_v16 }
 0x32d   :  { %v1650_v60 = vmul.f32 %v1634_v17, %v1570_v51  ;;  %v1684_v24 = vrot.slane %v1662_v59, %v1669_v22 }
 0x32e   :  { %v1638_v21 = vpop.permute.xlu0 %1637 }
 0x32f   :  { %v1643_v46 = vrot.slane %v1638_v21, %v2184_v26 }
 0x331   :  { %v1651_v10 = vmul.f32 %v1643_v46, %v1571_v52 }
 0x333   :  { %v1663_v11 = vcombine.low %v1650_v60, %v1651_v10 }
 0x335   :  { %v1691_v28 = vrot.slane %v1663_v11, %v1669_v22 }
 0x337   :  { %v1693_v23 = vcombine.low %v1684_v24, %v1691_v28 }
 0x339   :  { %v1707_v25 = vrot.slane %v1693_v23, %v1669_v22 }
 0x33b   :  { %v1708_v29 = vcombine.low %v1700_v27, %v1707_v25 }
 0x33d   :  { %1710 = vst [vmem:[#allocation9] sm:$0xff] %v1708_v29 }
 0x33e   :  { %1936 = shalt.err (!%p1933_p9)
}
 0x33f   :  { %1720 = dma.vmem_to_hbm [thread:$0]  %s1718_s21, 128, %s2295_s3, [#allocation8]  }
 0x340   :  { %1947 = dma.done.wait [#allocation8], 128  }
 0x341   :  { %1948 = vsyncadd [#allocation8], 4294967168 }
 0x342   :  { %1724 = vsyncpa [#allocation7], 1 }
 0x343   :  { %1725 = vsyncpa [#allocation8], 1 }

</bundles_post_ra>
